<compile_context>
chip_gen: v5e
topology: v5e:2x2
jax: 0.10.0
libtpu: 0.0.40
codegen_flags: <defaults>
</compile_context>

<pallas_src>
import functools

import jax
import jax.numpy as jnp
from jax.experimental import pallas as pl
from jax.experimental.pallas import tpu as pltpu


def _label_smoothing_partial_kernel(preds_ref, target_ref, parts_ref, *, batch: int):
    """Per-tile partial sums of the two loss terms.

    preds_ref : (TB, C) logits (any float dtype; computed in f32)
    target_ref: (TB, 1) int32 class indices
    parts_ref : (1, 2, 128) f32 — sublane 0 splatted with the tile's loss partial
                sum, sublane 1 with the nll partial sum.
    """
    i = pl.program_id(0)

    x = preds_ref[...].astype(jnp.float32)                 # (TB, C)
    t = target_ref[...]                                    # (TB, 1) int32
    tb, c = x.shape

    # Row-wise stats for the fused log_softmax (log_preds never materialized).
    m = jnp.max(x, axis=-1, keepdims=True)                 # (TB, 1)
    sum_x = jnp.sum(x, axis=-1, keepdims=True)             # (TB, 1)
    l = jnp.sum(jnp.exp(x - m), axis=-1, keepdims=True)    # (TB, 1)
    m_lse = m + jnp.log(l)                                 # (TB, 1)  max + logsumexp(shifted)

    # Gather x[r, t[r]] with an iota mask on the RAW logits (no one-hot matmul).
    col = jax.lax.broadcasted_iota(jnp.int32, x.shape, 1)  # (TB, C)
    x_t = jnp.sum(jnp.where(col == t, x, 0.0), axis=-1, keepdims=True)  # (TB, 1)

    # Mask rows beyond the true batch size (ragged last tile reads padded garbage).
    # NOTE: mask must stay BEFORE the reduce for correctness.
    row = jax.lax.broadcasted_iota(jnp.int32, (tb, 1), 0) + i * tb
    valid = row < batch                                    # (TB, 1) bool

    #  -sum_c log_softmax(x)[r, :]  ==  C*(m+lse) - sum_c x[r, c]
    loss_contrib = jnp.where(valid, c * m_lse - sum_x, 0.0)
    #  -log_softmax(x)[r, t_r]      ==  (m+lse) - x[r, t_r]
    nll_contrib = jnp.where(valid, m_lse - x_t, 0.0)

    loss_part = jnp.sum(loss_contrib, axis=0, keepdims=True)    # (1, 1)
    nll_part = jnp.sum(nll_contrib, axis=0, keepdims=True)      # (1, 1)

    # Pack both partials into one tiny lane-dense (1, 2, 128) block:
    # sublane 0 = loss partial, sublane 1 = nll partial.
    sub = jax.lax.broadcasted_iota(jnp.int32, parts_ref.shape, 1)
    loss_b = jnp.broadcast_to(loss_part.reshape(1, 1, 1), parts_ref.shape)
    nll_b = jnp.broadcast_to(nll_part.reshape(1, 1, 1), parts_ref.shape)
    parts_ref[...] = jnp.where(sub == 0, loss_b, nll_b)


def _vmem_budget_bytes() -> int:
    """VMEM budget to hand the compiler; conservative (v7x-safe) if unknown."""
    try:
        kind = jax.devices()[0].device_kind.lower()
    except Exception:
        kind = ""
    if (not kind) or ("v7" in kind):
        return 48 * 1024 * 1024      # v7x: 64 MiB physical per TC, keep headroom
    return 96 * 1024 * 1024          # v5e/v6e: 128 MiB physical


def _choose_block_rows(batch: int, n_classes: int, itemsize: int,
                       target_bytes: int, min_tiles: int = 2) -> int:
    """Batch-tile size: ~target_bytes per input tile, sublane-aligned, >=min_tiles tiles."""
    align = 8 if itemsize >= 4 else 16          # bf16 packs 16 rows / vreg
    if batch <= align:
        return batch                            # full-dim block is always legal
    rows = max(align, target_bytes // max(1, n_classes * itemsize))
    # Keep >= min_tiles tiles so v7x's two TensorCores both get work; the extra
    # ~0.35 us/step is negligible at multi-MiB tiles on v5e/v6e.
    if batch >= min_tiles * align:
        rows = min(rows, batch // min_tiles)
    rows = max(align, (rows // align) * align)
    return min(rows, (batch // align) * align)


def label_smoothing_loss(preds, target, smoothing: float = 0.1, block_rows=None):
    """preds: (B, C) float (f32 or bf16), target: (B,) int. Returns scalar f32."""
    assert 0.0 <= smoothing < 1.0
    B, C = preds.shape
    target2d = target.astype(jnp.int32).reshape(B, 1)

    itemsize = jnp.dtype(preds.dtype).itemsize
    align = 8 if itemsize >= 4 else 16
    vmem_budget = _vmem_budget_bytes()
    if block_rows is None:
        # Double-buffered preds tiles (2x) + tiny target/output blocks + headroom.
        block_rows = _choose_block_rows(B, C, itemsize, target_bytes=vmem_budget // 6)
    elif block_rows != B:
        # Manual override: round to the dtype's sublane alignment (16 for bf16).
        block_rows = max(align, (block_rows // align) * align)
    block_rows = min(int(block_rows), B)
    tb = int(block_rows)
    num_tiles = int(pl.cdiv(B, tb))

    parts = pl.pallas_call(
        functools.partial(_label_smoothing_partial_kernel, batch=B),
        out_shape=jax.ShapeDtypeStruct((num_tiles, 2, 128), jnp.float32),
        grid_spec=pltpu.PrefetchScalarGridSpec(
            num_scalar_prefetch=0,
            grid=(num_tiles,),
            in_specs=[
                pl.BlockSpec((tb, C), lambda i: (i, 0)),   # logits tile
                pl.BlockSpec((tb, 1), lambda i: (i, 0)),   # targets tile
            ],
            out_specs=pl.BlockSpec((1, 2, 128), lambda i: (i, 0, 0)),
        ),
        compiler_params=pltpu.CompilerParams(
            dimension_semantics=("parallel",),     # independent tiles -> both TCs on v7x
            vmem_limit_bytes=vmem_budget,
        ),
    )(preds, target2d)

    # Final combine (normalize by the GLOBAL batch size, not the tile size).
    loss_sum = jnp.sum(parts[:, 0, 0])
    nll_sum = jnp.sum(parts[:, 1, 0])
    loss = loss_sum / B
    nll = nll_sum / B
    return smoothing * (loss / C) + (1.0 - smoothing) * nll


def _reference(preds, target, smoothing=0.1):
    log_preds = jax.nn.log_softmax(preds.astype(jnp.float32), axis=-1)
    n = preds.shape[-1]
    loss = jnp.mean(-jnp.sum(log_preds, axis=-1))
    nll = jnp.mean(-jnp.take_along_axis(log_preds, target[:, None], axis=-1)[:, 0])
    return smoothing * (loss / n) + (1.0 - smoothing) * nll


if __name__ == "__main__":
    # B not a multiple of the tile size -> exercises multi-tile grid + ragged-row masking.
    B, C = 52, 512
    key = jax.random.PRNGKey(0)
    k1, k2 = jax.random.split(key)
    preds = jax.random.normal(k1, (B, C), dtype=jnp.float32)
    target = jax.random.randint(k2, (B,), 0, C, dtype=jnp.int32)

    # 1) default tiling path (auto tile size, >=2 tiles, ragged tail)
    out = jax.block_until_ready(label_smoothing_loss(preds, target, smoothing=0.1))
    ref = _reference(preds, target, smoothing=0.1)
    assert jnp.allclose(out, ref, atol=1e-4, rtol=1e-5), (out, ref)

    # 2) manual small-tile path (forces a multi-tile grid regardless of budget)
    out2 = jax.block_until_ready(
        label_smoothing_loss(preds, target, smoothing=0.1, block_rows=16))
    assert jnp.allclose(out2, ref, atol=1e-4, rtol=1e-5), (out2, ref)

    # 3) bf16 streaming path (halves HBM bytes; kernel upcasts to f32 internally)
    preds_bf16 = preds.astype(jnp.bfloat16)
    out3 = jax.block_until_ready(label_smoothing_loss(preds_bf16, target, smoothing=0.1))
    ref3 = _reference(preds_bf16, target, smoothing=0.1)
    assert jnp.allclose(out3, ref3, atol=2e-3, rtol=1e-3), (out3, ref3)

    print("KERNEL_OK")
</pallas_src>

<mosaic_0001>
module attributes {stable_mosaic.version = 11 : i64} {
  func.func @_label_smoothing_partial_kernel(%arg0: i32, %arg1: memref<24x512xf32, #tpu.memory_space<vmem>>, %arg2: memref<24x1xi32, #tpu.memory_space<vmem>>, %arg3: memref<1x2x128xf32, #tpu.memory_space<vmem>>) attributes {dimension_semantics = [#tpu.dimension_semantics<parallel>], iteration_bounds = array<i64: 3>, scalar_prefetch = 0 : i64, scratch_operands = 0 : i64, tpu.core_type = #tpu.core_type<tc>, window_params = [{transform_indices = @transform_0, window_bounds = array<i64: 24, 512>}, {transform_indices = @transform_1, window_bounds = array<i64: 24, 1>}, {transform_indices = @transform_2, window_bounds = array<i64: 1, 2, 128>}]} {
    %c0 = arith.constant 0 : index
    %c0_0 = arith.constant 0 : index
    %0 = vector.load %arg1[%c0, %c0_0] : memref<24x512xf32, #tpu.memory_space<vmem>>, vector<24x512xf32>
    %c0_1 = arith.constant 0 : index
    %c0_2 = arith.constant 0 : index
    %1 = vector.load %arg2[%c0_1, %c0_2] : memref<24x1xi32, #tpu.memory_space<vmem>>, vector<24x1xi32>
    %cst = arith.constant dense<0xFF800000> : vector<24xf32>
    %2 = vector.multi_reduction <maximumf>, %0, %cst [1] : vector<24x512xf32> to vector<24xf32>
    %3 = vector.shape_cast %2 : vector<24xf32> to vector<24x1xf32>
    %cst_3 = arith.constant dense<0.000000e+00> : vector<24xf32>
    %4 = vector.multi_reduction <add>, %0, %cst_3 [1] : vector<24x512xf32> to vector<24xf32>
    %5 = vector.shape_cast %4 : vector<24xf32> to vector<24x1xf32>
    %6 = vector.broadcast %3 : vector<24x1xf32> to vector<24x512xf32>
    %7 = arith.subf %0, %6 : vector<24x512xf32>
    %8 = math.exp %7 : vector<24x512xf32>
    %cst_4 = arith.constant dense<0.000000e+00> : vector<24xf32>
    %9 = vector.multi_reduction <add>, %8, %cst_4 [1] : vector<24x512xf32> to vector<24xf32>
    %10 = vector.shape_cast %9 : vector<24xf32> to vector<24x1xf32>
    %11 = math.log %10 : vector<24x1xf32>
    %12 = arith.addf %3, %11 : vector<24x1xf32>
    %13 = tpu.iota {dimensions = array<i32: 1>} : vector<24x512xi32>
    %14 = vector.broadcast %1 : vector<24x1xi32> to vector<24x512xi32>
    %15 = arith.cmpi eq, %13, %14 : vector<24x512xi32>
    %cst_5 = arith.constant 0.000000e+00 : f32
    %16 = vector.broadcast %cst_5 : f32 to vector<24x512xf32>
    %17 = arith.select %15, %0, %16 : vector<24x512xi1>, vector<24x512xf32>
    %cst_6 = arith.constant dense<0.000000e+00> : vector<24xf32>
    %18 = vector.multi_reduction <add>, %17, %cst_6 [1] : vector<24x512xf32> to vector<24xf32>
    %19 = vector.shape_cast %18 : vector<24xf32> to vector<24x1xf32>
    %20 = tpu.iota {dimensions = array<i32: 0>} : vector<24x1xi32>
    %c24_i32 = arith.constant 24 : i32
    %21 = arith.muli %arg0, %c24_i32 : i32
    %22 = vector.broadcast %21 : i32 to vector<24x1xi32>
    %23 = arith.addi %20, %22 : vector<24x1xi32>
    %c52_i32 = arith.constant 52 : i32
    %24 = vector.broadcast %c52_i32 : i32 to vector<24x1xi32>
    %25 = arith.cmpi slt, %23, %24 : vector<24x1xi32>
    %cst_7 = arith.constant 5.120000e+02 : f32
    %26 = vector.broadcast %cst_7 : f32 to vector<24x1xf32>
    %27 = arith.mulf %26, %12 : vector<24x1xf32>
    %28 = arith.subf %27, %5 : vector<24x1xf32>
    %cst_8 = arith.constant 0.000000e+00 : f32
    %29 = vector.broadcast %cst_8 : f32 to vector<24x1xf32>
    %30 = arith.select %25, %28, %29 : vector<24x1xi1>, vector<24x1xf32>
    %31 = arith.subf %12, %19 : vector<24x1xf32>
    %cst_9 = arith.constant 0.000000e+00 : f32
    %32 = vector.broadcast %cst_9 : f32 to vector<24x1xf32>
    %33 = arith.select %25, %31, %32 : vector<24x1xi1>, vector<24x1xf32>
    %cst_10 = arith.constant dense<0.000000e+00> : vector<1xf32>
    %34 = vector.multi_reduction <add>, %30, %cst_10 [0] : vector<24x1xf32> to vector<1xf32>
    %35 = vector.shape_cast %34 : vector<1xf32> to vector<1x1xf32>
    %cst_11 = arith.constant dense<0.000000e+00> : vector<1xf32>
    %36 = vector.multi_reduction <add>, %33, %cst_11 [0] : vector<24x1xf32> to vector<1xf32>
    %37 = vector.shape_cast %36 : vector<1xf32> to vector<1x1xf32>
    %38 = tpu.iota {dimensions = array<i32: 1>} : vector<1x2x128xi32>
    %39 = vector.shape_cast %35 : vector<1x1xf32> to vector<1x1x1xf32>
    %40 = vector.shape_cast %39 : vector<1x1x1xf32> to vector<1x1x1xf32>
    %41 = vector.broadcast %40 : vector<1x1x1xf32> to vector<1x2x128xf32>
    %42 = vector.shape_cast %37 : vector<1x1xf32> to vector<1x1x1xf32>
    %43 = vector.shape_cast %42 : vector<1x1x1xf32> to vector<1x1x1xf32>
    %44 = vector.broadcast %43 : vector<1x1x1xf32> to vector<1x2x128xf32>
    %c0_i32 = arith.constant 0 : i32
    %45 = vector.broadcast %c0_i32 : i32 to vector<1x2x128xi32>
    %46 = arith.cmpi eq, %38, %45 : vector<1x2x128xi32>
    %47 = arith.select %46, %41, %44 : vector<1x2x128xi1>, vector<1x2x128xf32>
    %c0_12 = arith.constant 0 : index
    %c0_13 = arith.constant 0 : index
    %c0_14 = arith.constant 0 : index
    %48 = vector.load %arg3[%c0_12, %c0_13, %c0_14] : memref<1x2x128xf32, #tpu.memory_space<vmem>>, vector<1x2x128xf32>
    tpu.vector_store %arg3[%c0_12, %c0_13, %c0_14], %47 {strides = array<i32>} : memref<1x2x128xf32, #tpu.memory_space<vmem>>, vector<1x2x128xf32>,
    return
  }
  func.func @transform_0(%arg0: i32) -> (i32, i32) {
    %c0_i32 = arith.constant 0 : i32
    %c0_i32_0 = arith.constant 0 : i32
    return %arg0, %c0_i32 : i32, i32
  }
  func.func @transform_1(%arg0: i32) -> (i32, i32) {
    %c0_i32 = arith.constant 0 : i32
    %c0_i32_0 = arith.constant 0 : i32
    return %arg0, %c0_i32 : i32, i32
  }
  func.func @transform_2(%arg0: i32) -> (i32, i32, i32) {
    %c0_i32 = arith.constant 0 : i32
    %c0_i32_0 = arith.constant 0 : i32
    %c0_i32_1 = arith.constant 0 : i32
    return %arg0, %c0_i32, %c0_i32_0 : i32, i32, i32
  }
}

</mosaic_0001>

<bundles_post_ra>
// kernel: tpu_custom_call.1
= control target key start
LH: loop header
LB: loop body
LE: loop exit
PB: predicated region body
PF: predicated region fallthrough
CT: control target
= control target key end

     0   :  { %7 = vsyncpa [#allocation3], 0  ;;  %s1019_s0 = inlined_call_operand.hbm [shape: f32[52,512], index: 0, kind: input, shape index: {}]   ;;  %s1020_s1 = inlined_call_operand.vmem [shape: s32[52,1], index: 1, kind: input, shape index: {}]   ;;  %s1021_s2 = inlined_call_operand.hbm [shape: f32[3,2,128], index: 2, kind: output, shape index: {}]  }
   0x1   :  { %9 = vsyncpa [#allocation3 + $0x1], 0 }
   0x2   :  { %10 = vsyncpa [#allocation4], 0 }
   0x3   :  { %12 = vsyncpa [#allocation4 + $0x1], 0  ;;  %s748_s9 = smov 0   ;;  %s750_s10 = smov 0  }
   0x4   :  { %s752_s11 = smov 0   ;;  %s754_s12 = smov 0  }
   0x5 LB: > { %s769_s13 = sadd.s32 4294967295, %s727_s12   ;;  %s523_s14 = sadd.s32 4294967294, %s727_s12   ;;  %s727_s12 = sphi %s754_s12, %s1029_s12   ;;  %s723_s11 = sphi %s752_s11, %s1028_s11   ;;  %s719_s10 = sphi %s750_s10, %s1027_s10   ;;  %s715_s9 = sphi %s748_s9, %s1026_s9  }
   0x6   : > { %s773_s15 = sadd.s32 1, %s727_s12   ;;  %s25_s16 = sadd.s32 1, %s723_s11 }
   0x7   : > { %s22_s17 = ssub.s32 %s727_s12, %s773_s15  ;;  %p32_p0 = scmp.ne.s32.totalorder %s723_s11, %s719_s10 }
   0x8   : > { %p23_p1 = scmp.eq.s32.totalorder %s22_s17, 0  ;;  %p33_p2 = scmp.eq.s32.totalorder %s727_s12, 0 }
   0x9   : > { %p38_p3 = scmp.ne.s32.totalorder %s719_s10, %s715_s9  ;;  %p39_p4 = scmp.eq.s32.totalorder %s769_s13, 0 }
   0xa   : > { %s785_s18 = scalar_select %p23_p1, %s723_s11, %s25_s16  }
   0xb   : > { %p34_p5 = por %p33_p2, %p32_p0  ;;  %p787_p6 = por %p39_p4, %p38_p3 }
   0xc   : > { %p88_p7 = scmp.eq.s32.totalorder %s769_s13, 2  ;;  %p94_p8 = scmp.eq.s32.totalorder %s523_s14, 2 }
   0xd   : > { %p525_p11 = scmp.ge.s32.totalorder %s727_s12, 3 }
   0xe   : > { %p792_p9 = por %p88_p7, %p32_p0  ;;  %p796_p10 = por %p94_p8, %p38_p3 }
   0xf   : > { %110 = sbr.rel (%p525_p11) target bundleno = 58 (0x3a), region = 16 }
  0x14   : > { %113 = sbr.rel (!%p34_p5) target bundleno = 58 (0x3a), region = 20  ;;  %s114_s22 = sand.u32 (%p34_p5), 1, %s723_s11  }
  0x15   : > { %s119_s23 = smul.u32 (%p34_p5), 3, %s727_s12  ;;  %s806_s29 = scalar_lea.sflag (%p34_p5), [#allocation3], %s114_s22 }
  0x16   : > { %s544_s24 = smul.u32 (%p34_p5), 96, %s114_s22 }
  0x17   : > { %s120_s25 = ssub.s32 (%p34_p5), 7, %s119_s23 }
  0x18   : > { %p121_p12 = scmp.lt.s32.totalorder (%p34_p5), %s120_s25, 3  ;;  %s118_s30 = scalar_lea.vmem (%p34_p5), [#allocation2], %s544_s24 }
  0x1a   : > { %s1031_s25 = smov (!%p121_p12, %s120_s25), 3 }
  0x1b   : > { %s540_s26 = sshll.u32 %s1031_s25, 5 }
  0x1c   : > { %s125_s27 = ssub.s32 96, %s540_s26 }
  0x1d   : > { %s126_s28 = sshll.u32 %s125_s27, 4 }
  0x1e   : > { %127 = vsyncadd %s806_s29, %s126_s28  ;;  %p809_p13 = scmp.ne.s32.totalorder %s540_s26, 0  ;;  %s543_s4 = smul.u32 96, %s727_s12 }
  0x1f   : > { %s814_s5 = sshll.u32 %s118_s30, 4  ;;  %s532_s6 = sshll.u32 %s1031_s25, 9  ;;  %s136_s5 = int_to_ptr.vmem [resolvable:$true] %s814_s5 }
  0x20   : > { %s131_s14 = scalar_lea.hbm %s1019_s0, %s543_s4  ;;  %s624_s22 = sshrl.u32 %s532_s6, 4 }
  0x21   : > { %s133_s16 = sshll.u32 %s131_s14, 4  ;;  %s633_s27 = scalar_lea.hbm %s1019_s0, 224  ;;  %s821_s16 = int_to_ptr.hbm [resolvable:$true] %s133_s16 }
  0x22   : > { %s622_s17 = sshra.s32 %s821_s16, 4  ;;  %s623_s17 = int_to_ptr.hbm [resolvable:$true] %s622_s17 }
  0x23   : > { %s629_s23 = scalar_lea.hbm %s623_s17, %s624_s22  ;;  %p634_p3 = scmp.lt.s32.totalorder %s623_s17, %s1019_s0 }
  0x24   : > { %p630_p0 = scmp.ne.s32.totalorder %s623_s17, %s629_s23  ;;  %p635_p4 = scmp.lt.s32.totalorder %s633_s27, %s629_s23 }
  0x26   : > { %p631_p1 = pnand %p630_p0, %p809_p13  ;;  %p636_p5 = por %p635_p4, %p634_p3 }
  0x28   : > { %p632_p2 = pneg %p631_p1 }
  0x2a   : > { %p637_p7 = pnand %p636_p5, %p632_p2 }
  0x2c   : > { %640 = shalt.err (!%p637_p7)
}
  0x2d   : > { %s641_s4 = sshra.s32 %s136_s5, 4  ;;  %s729_s8 = smov [#allocation2]   ;;  %s642_s4 = int_to_ptr.vmem [resolvable:$true] %s641_s4 }
  0x2e   : > { %s648_s7 = scalar_lea.vmem %s642_s4, %s624_s22  ;;  %s652_s14 = scalar_lea.vmem %s729_s8, 192 }
  0x2f   : > { %p649_p8 = scmp.ne.s32.totalorder %s642_s4, %s648_s7  ;;  %p654_p0 = scmp.lt.s32.totalorder %s652_s14, %s648_s7 }
  0x31   : > { %p650_p11 = pnand %p649_p8, %p809_p13 }
  0x33   : > { %p651_p12 = pneg %p650_p11 }
  0x35   : > { %p656_p1 = pnand %p654_p0, %p651_p12 }
  0x37   : > { %659 = shalt.err (!%p656_p1)
}
  0x38   : > { %s730_s17 = smov 512   ;;  %s731_s23 = smov 32  }
  0x39   : > { %141 = dma.hbm_to_vmem [thread:$0]  (%p809_p13), %s821_s16, %s532_s6, %s136_s5, %s806_s29, %s730_s17, %s730_s17, %s731_s23  }
  0x3a PF: > { %p533_p2 = scmp.ge.s32.totalorder %s727_s12, 1  ;;  %p160_p3 = scmp.lt.s32.totalorder %s727_s12, 4 }
  0x3c   : > { %p161_p4 = pnand %p533_p2, %p160_p3 }
  0x3d   : > { %s849_s22 = sand.u32 (!%p161_p4), 1, %s719_s10  }
  0x3e   : > { %164 = sbr.rel (%p161_p4) target bundleno = 386 (0x182), region = 28  ;;  %s167_s26 = scalar_lea.sflag (!%p161_p4), [#allocation3], %s849_s22 }
  0x3f   : > { %s545_s24 = smul.u32 (!%p161_p4), 96, %s849_s22 }
  0x41   : > { %s170_s3 = scalar_lea.vmem (!%p161_p4), [#allocation2], %s545_s24 }
  0x43   : > { %706 = dma.done.wait (%p787_p6), %s167_s26, 1536  }
  0x44   : > { %708 = vsyncadd (%p787_p6), %s167_s26, 4294965760  ;;  %s207_s25 = smul.u32 3, %s769_s13  ;;  %v732_v0 = vmov 0   ;;  %v858_v1 = vld [vmem:[%s170_s3 + $0x40] sm:$0xff]  ;;  %v860_v2 = vld [vmem:[%s170_s3 + $0x48] sm:$0xff]  ;;  %v326_v35 = vlaneseq  ;;  %s534_s27 = sshll.u32 %s849_s22, 1 }
  0x45   : > { %589 = vset.pattern.permute.xlu1 %v732_v0  ;;  %590 = vset.pattern.permute.xlu2 %v732_v0  ;;  %v862_v3 = vld [vmem:[%s170_s3 + $0x50] sm:$0xff]  ;;  %v864_v4 = vld [vmem:[%s170_s3 + $0x58] sm:$0xff]  ;;  %v868_v6 = vld [vmem:[%s170_s3] sm:$0xff]  ;;  %s383_s16 = smul.u32 24, %s769_s13  ;;  %s537_s28 = sshll.u32 %s769_s13, 1 }
  0x46   : > { %p212_p13 = scmp.lt.s32.totalorder %s207_s25, 6  ;;  %591 = vset.pattern.permute.xlu0 %v732_v0  ;;  %v246_v5 = vmax.f32 %v858_v1, %v862_v3  ;;  %v870_v7 = vld [vmem:[%s170_s3 + $0x8] sm:$0xff]  ;;  %v247_v8 = vmax.f32 %v860_v2, %v864_v4  ;;  %v874_v9 = vld [vmem:[%s170_s3 + $0x10] sm:$0xff]  ;;  %v876_v10 = vld [vmem:[%s170_s3 + $0x18] sm:$0xff]  ;;  %v923_v43 = vand.u32 127, %v326_v35  ;;  %s436_s7 = scalar_lea.hbm %s1021_s2, %s537_s28 }
  0x47   : > { %v236_v11 = vmax.f32 %v868_v6, %v874_v9  ;;  %v237_v12 = vmax.f32 %v870_v7, %v876_v10  ;;  %v882_v13 = vld [vmem:[%s170_s3 + $0x20] sm:$0xff]  ;;  %v884_v14 = vld [vmem:[%s170_s3 + $0x28] sm:$0xff]  ;;  %v889_v16 = vld [vmem:[%s170_s3 + $0x30] sm:$0xff]  ;;  %v251_v52 = vadd.f32 %v870_v7, %v868_v6  ;;  %s200_s8 = scalar_lea.vmem [#allocation5], %s534_s27  ;;  %s440_s17 = sshll.u32 %s436_s7, 4  ;;  %s441_s17 = int_to_ptr.hbm [resolvable:$true] %s440_s17 }
  0x48   : > { %s1033_s25 = smov (!%p212_p13, %s207_s25), 6  ;;  %v248_v15 = vmax.f32 %v246_v5, %v247_v8  ;;  %v891_v17 = vld [vmem:[%s170_s3 + $0x38] sm:$0xff]  ;;  %v241_v20 = vmax.f32 %v882_v13, %v889_v16  ;;  %v256_v33 = vadd.f32 %v884_v14, %v882_v13  ;;  %v933_v56 = vadd.s32 128, %v923_v43  ;;  %s438_s14 = sshll.u32 %s200_s8, 4  ;;  %s439_s14 = int_to_ptr.vmem [resolvable:$true] %s438_s14 }
  0x49   : > { %s535_s29 = sshll.u32 %s1033_s25, 3  ;;  %v238_v19 = vmax.f32 %v236_v11, %v237_v12  ;;  %v242_v21 = vmax.f32 %v884_v14, %v891_v17  ;;  %v252_v61 = vadd.f32 %v251_v52, %v874_v9  ;;  %v329_v5 = vadd.s32 256, %v923_v43  ;;  %s426_s13 = scalar_lea.sflag [#allocation4], %s849_s22 }
  0x4a   : > { %s215_s6 = scalar_lea.vmem %s1020_s1, %s535_s29  ;;  %249 = vmax.xlane.f32.xlu1 %v248_v15  ;;  %v257_v36 = vadd.f32 %v256_v33, %v889_v16  ;;  %s675_s23 = sshra.s32 %s441_s17, 4  ;;  %s676_s23 = int_to_ptr.hbm [resolvable:$true] %s675_s23 }
  0x4b   : > { %v234_v18 = vld [vmem:[%s215_s6 + $0x8] sm:$0xff]  ;;  %239 = vmax.xlane.f32.xlu0 %v238_v19  ;;  %v235_v22 = vld [vmem:[%s215_s6 + $0x10] sm:$0xff]  ;;  %v243_v23 = vmax.f32 %v241_v20, %v242_v21  ;;  %v233_v24 = vld [vmem:[%s215_s6] sm:$0xff]  ;;  %s677_s24 = scalar_lea.hbm %s676_s23, 2  ;;  %s681_s25 = scalar_lea.hbm %s1021_s2, 6 }
  0x4c   : > { %335 = vperm.xlu2 %590, %v234_v18   ;;  %v258_v44 = vadd.f32 %v257_v36, %v891_v17  ;;  %p678_p6 = scmp.ne.s32.totalorder %s676_s23, %s677_s24  ;;  %p682_p8 = scmp.lt.s32.totalorder %s676_s23, %s1021_s2 }
  0x4d   : > { %p683_p11 = scmp.lt.s32.totalorder %s681_s25, %s677_s24 }
  0x4e   : > { %p679_p5 = pnand %p678_p6, %p792_p9 }
  0x4f   : > { %p684_p12 = por %p683_p11, %p682_p8 }
  0x50   : > { %p680_p7 = pneg %p679_p5 }
  0x52   : > { %p685_p0 = pnand %p684_p12, %p680_p7 }
  0x53   : > { %244 = vmax.xlane.f32.xlu0 %v243_v23 }
  0x54   : > { %338 = vperm.xlu2 %590, %v235_v22   ;;  %v253_v22 = vadd.f32 %v252_v61, %v876_v10 }
  0x63   : > { %332 = vperm.xlu1 %589, %v233_v24  }
  0x8d   : > { %259 = vadd.xlane.f32.xlu1 %v258_v44 }
  0xa6   : > { %v907_v32 = vpop.permute.xlu2 %335 }
  0xa7   : > { %vm344_vm8 = vcmp.eq.s32.totalorder %v923_v43, %v907_v32  ;;  %vm345_vm9 = vcmp.eq.s32.totalorder %v933_v56, %v907_v32  ;;  %vm346_vm10 = vcmp.eq.s32.totalorder %v329_v5, %v907_v32 }
  0xae   : > { %v339_v53 = vpop.permute.xlu2 %338 }
  0xaf   : > { %vm348_vm0 = vcmp.eq.s32.totalorder %v923_v43, %v339_v53  ;;  %vm349_vm1 = vcmp.eq.s32.totalorder %v933_v56, %v339_v53  ;;  %vm350_vm2 = vcmp.eq.s32.totalorder %v329_v5, %v339_v53 }
  0xb0   : > { %v360_v11 = vsel %vm348_vm0, %v858_v1, 0.0  ;;  %v361_v12 = vsel %vm349_vm1, %v860_v2, 0.0 }
  0xbd   : > { %v926_v48 = vpop.xlane.xlu1 %249 }
  0xbe   : > { %v897_v25 = vpop.xlane.xlu0 %239  ;;  %v274_v54 = vsub.f32 %v858_v1, %v926_v48  ;;  %v275_v60 = vsub.f32 %v860_v2, %v926_v48  ;;  %v276_v20 = vsub.f32 %v862_v3, %v926_v48 }
  0xbf   : > { %v266_v26 = vsub.f32 %v868_v6, %v897_v25  ;;  %v267_v27 = vsub.f32 %v870_v7, %v897_v25  ;;  %v268_v28 = vsub.f32 %v874_v9, %v897_v25  ;;  %v269_v30 = vsub.f32 %v876_v10, %v897_v25 }
  0xc0   : > { %v294_v63 = vmul.f32 1.442695, %v274_v54  ;;  %v296_v21 = vmul.f32 1.442695, %v275_v60  ;;  %v298_v33 = vmul.f32 1.442695, %v276_v20 }
  0xc1   : > { %v278_v29 = vmul.f32 1.442695, %v266_v26  ;;  %v280_v31 = vmul.f32 1.442695, %v267_v27  ;;  %v282_v34 = vmul.f32 1.442695, %v268_v28  ;;  %v374_v27 = vadd.f32 %v361_v12, %v360_v11 }
  0xc2   : > { %v284_v38 = vmul.f32 1.442695, %v269_v30  ;;  %v330_v26 = vadd.s32 384, %v923_v43  ;;  %v362_v28 = vsel %vm350_vm2, %v862_v3, 0.0  ;;  %v358_v54 = vsel %vm346_vm10, %v889_v16, 0.0 }
  0xc3   : > { %592 = vpow2.f32 %v278_v29 }
  0xc4   : > { %594 = vpow2.f32 %v280_v31  ;;  %vm351_vm6 = vcmp.eq.s32.totalorder %v330_v26, %v339_v53  ;;  %vm347_vm11 = vcmp.eq.s32.totalorder %v330_v26, %v907_v32 }
  0xc5   : > { %596 = vpow2.f32 %v282_v34 }
  0xc6   : > { %v912_v37 = vpop.xlane.xlu0 %244  ;;  %598 = vpow2.f32 %v284_v38  ;;  %v375_v38 = vadd.f32 %v374_v27, %v362_v28 }
  0xc7   : > { %v270_v39 = vsub.f32 %v882_v13, %v912_v37  ;;  %v271_v40 = vsub.f32 %v884_v14, %v912_v37  ;;  %v272_v41 = vsub.f32 %v889_v16, %v912_v37  ;;  %v273_v42 = vsub.f32 %v891_v17, %v912_v37 }
  0xc9   : > { %v286_v45 = vmul.f32 1.442695, %v270_v39  ;;  %v288_v46 = vmul.f32 1.442695, %v271_v40  ;;  %v290_v47 = vmul.f32 1.442695, %v272_v41  ;;  %v593_v50 = vpop.eup %592  ;;  %v277_v39 = vsub.f32 %v864_v4, %v926_v48 }
  0xca   : > { %v292_v49 = vmul.f32 1.442695, %v273_v42  ;;  %v595_v51 = vpop.eup %594  ;;  %v363_v40 = vsel %vm351_vm6, %v864_v4, 0.0 }
  0xcb   : > { %600 = vpow2.f32 %v286_v45  ;;  %v302_v55 = vadd.f32 %v595_v51, %v593_v50  ;;  %v597_v57 = vpop.eup %596  ;;  %v300_v45 = vmul.f32 1.442695, %v277_v39  ;;  %v356_v50 = vsel %vm344_vm8, %v882_v13, 0.0 }
  0xcc   : > { %602 = vpow2.f32 %v288_v46  ;;  %v599_v59 = vpop.eup %598  ;;  %v357_v51 = vsel %vm345_vm9, %v884_v14, 0.0 }
  0xcd   : > { %604 = vpow2.f32 %v290_v47  ;;  %v303_v58 = vadd.f32 %v597_v57, %v302_v55  ;;  %v369_v53 = vadd.f32 %v357_v51, %v356_v50  ;;  %v359_v55 = vsel %vm347_vm11, %v891_v17, 0.0 }
  0xce   : > { %606 = vpow2.f32 %v292_v49 }
  0xcf   : > { %v304_v0 = vadd.f32 %v599_v59, %v303_v58  ;;  %608 = vpow2.f32 %v294_v63  ;;  %v384_v63 = vstv %s383_s16 }
  0xd0   : > { %610 = vpow2.f32 %v296_v21 }
  0xd1   : > { %v601_v62 = vpop.eup %600  ;;  %305 = vadd.xlane.f32.xlu0 %v304_v0  ;;  %612 = vpow2.f32 %v298_v33 }
  0xd2   : > { %v603_v8 = vpop.eup %602  ;;  %614 = vpow2.f32 %v300_v45 }
  0xd3   : > { %v605_v15 = vpop.eup %604  ;;  %v307_v18 = vadd.f32 %v603_v8, %v601_v62  ;;  %v973_v62 = vshrl.u32 %v326_v35, 7 }
  0xd4   : > { %v607_v19 = vpop.eup %606 }
  0xd5   : > { %v333_v23 = vpop.permute.xlu1 %332  ;;  %v308_v24 = vadd.f32 %v605_v15, %v307_v18  ;;  %v609_v41 = vpop.eup %608  ;;  %v382_v0 = vadd.s32 16, %v973_v62  ;;  %v385_v8 = vadd.s32 %v384_v63, %v973_v62  ;;  %vm422_vm15 = vcmp.eq.s32.totalorder %v973_v62, 0 }
  0xd6   : > { %vm340_vm3 = vcmp.eq.s32.totalorder %v923_v43, %v333_v23  ;;  %vm341_vm4 = vcmp.eq.s32.totalorder %v933_v56, %v333_v23  ;;  %vm342_vm5 = vcmp.eq.s32.totalorder %v329_v5, %v333_v23  ;;  %vm343_vm7 = vcmp.eq.s32.totalorder %v330_v26, %v333_v23 }
  0xd7   : > { %v309_v29 = vadd.f32 %v607_v19, %v308_v24  ;;  %v352_v30 = vsel %vm340_vm3, %v868_v6, 0.0  ;;  %v353_v31 = vsel %vm341_vm4, %v870_v7, 0.0  ;;  %v354_v34 = vsel %vm342_vm5, %v874_v9, 0.0  ;;  %v611_v7 = vpop.eup %610 }
  0xd8   : > { %v364_v36 = vadd.f32 %v353_v31, %v352_v30  ;;  %v376_v6 = vadd.f32 %v375_v38, %v363_v40  ;;  %v355_v44 = vsel %vm343_vm7, %v876_v10, 0.0  ;;  %v312_v9 = vadd.f32 %v611_v7, %v609_v41  ;;  %v613_v47 = vpop.eup %612 }
  0xd9   : > { %310 = vadd.xlane.f32.xlu2 %v309_v29  ;;  %254 = vadd.xlane.f32.xlu0 %v253_v22  ;;  %v615_v10 = vpop.eup %614  ;;  %v370_v43 = vadd.f32 %v369_v53, %v358_v54  ;;  %v261_v56 = vadd.f32 %v860_v2, %v858_v1  ;;  %v387_v35 = vadd.s32 %v384_v63, %v382_v0  ;;  %vm388_vm12 = vcmp.lt.s32.totalorder %v385_v8, 52 }
  0xda   : > { %v365_v42 = vadd.f32 %v364_v36, %v354_v34  ;;  %v313_v49 = vadd.f32 %v613_v47, %v312_v9 }
  0xdb   : > { %v371_v13 = vadd.f32 %v370_v43, %v359_v55  ;;  %v262_v14 = vadd.f32 %v261_v56, %v862_v3  ;;  %v381_v3 = vadd.s32 8, %v973_v62  ;;  %vm390_vm14 = vcmp.lt.s32.totalorder %v387_v35, 52 }
  0xdc   : > { %v366_v46 = vadd.f32 %v365_v42, %v355_v44  ;;  %v314_v52 = vadd.f32 %v615_v10, %v313_v49 }
  0xdd   : > { %v263_v57 = vadd.f32 %v262_v14, %v864_v4  ;;  %v386_v11 = vadd.s32 %v384_v63, %v381_v3 }
  0xdf   : > { %vm389_vm13 = vcmp.lt.s32.totalorder %v386_v11, 52 }
  0xe1   : > { %377 = vadd.xlane.f32.xlu2 %v376_v6  ;;  %367 = vadd.xlane.f32.xlu0 %v366_v46 }
  0xe9   : > { %315 = vadd.xlane.f32.xlu0 %v314_v52 }
  0xf1   : > { %372 = vadd.xlane.f32.xlu0 %v371_v13 }
  0xf9   : > { %264 = vadd.xlane.f32.xlu0 %v263_v57 }
 0x100   : > { %v260_v19 = vpop.xlane.xlu1 %259 }
 0x144   : > { %v306_v58 = vpop.xlane.xlu0 %305 }
 0x14c   : > { %v255_v59 = vpop.xlane.xlu0 %254  ;;  %v311_v16 = vpop.xlane.xlu2 %310 }
 0x14d   : > { %616 = vlog2.f32 %v311_v16 }
 0x14e   : > { %618 = vlog2.f32 %v306_v58 }
 0x153   : > { %v617_v60 = vpop.eup %616 }
 0x154   : > { %v368_v32 = vpop.xlane.xlu0 %367  ;;  %v619_v61 = vpop.eup %618  ;;  %v320_v17 = vmul.f32 0.6931472, %v617_v60 }
 0x155   : > { %v318_v2 = vmul.f32 0.6931472, %v619_v61 }
 0x156   : > { %v324_v4 = vadd.f32 %v320_v17, %v912_v37 }
 0x157   : > { %v323_v5 = vadd.f32 %v318_v2, %v897_v25  ;;  %v378_v25 = vpop.xlane.xlu2 %377 }
 0x158   : > { %v392_v18 = vmul.f32 512.0, %v324_v4 }
 0x159   : > { %v400_v15 = vsub.f32 %v323_v5, %v368_v32  ;;  %v391_v22 = vmul.f32 512.0, %v323_v5 }
 0x15a   : > { %v395_v26 = vsub.f32 %v392_v18, %v260_v19 }
 0x15b   : > { %v403_v24 = vsel %vm388_vm12, %v400_v15, 0.0  ;;  %v394_v30 = vsub.f32 %v391_v22, %v255_v59 }
 0x15c   : > { %v316_v1 = vpop.xlane.xlu0 %315  ;;  %v398_v33 = vsel %vm389_vm13, %v395_v26, 0.0 }
 0x15d   : > { %620 = vlog2.f32 %v316_v1  ;;  %v397_v39 = vsel %vm388_vm12, %v394_v30, 0.0 }
 0x15e   : > { %v406_v41 = vadd.f32 %v398_v33, %v397_v39 }
 0x163   : > { %v621_v12 = vpop.eup %620 }
 0x164   : > { %v322_v20 = vmul.f32 0.6931472, %v621_v12  ;;  %v373_v21 = vpop.xlane.xlu0 %372 }
 0x165   : > { %v401_v23 = vsub.f32 %v324_v4, %v373_v21 }
 0x166   : > { %v325_v37 = vadd.f32 %v322_v20, %v926_v48 }
 0x167   : > { %v404_v27 = vsel %vm389_vm13, %v401_v23, 0.0 }
 0x168   : > { %v402_v28 = vsub.f32 %v325_v37, %v378_v25  ;;  %v414_v29 = vadd.f32 %v404_v27, %v403_v24  ;;  %v393_v36 = vmul.f32 512.0, %v325_v37 }
 0x16a   : > { %v405_v31 = vsel %vm390_vm14, %v402_v28, 0.0 }
 0x16b   : > { %v415_v34 = vadd.f32 %v414_v29, %v405_v31 }
 0x16c   : > { %v265_v38 = vpop.xlane.xlu0 %264 }
 0x16d   : > { %v416_v48 = vrot.slane %v415_v34, 4  ;;  %v396_v40 = vsub.f32 %v393_v36, %v265_v38 }
 0x16f   : > { %v417_v42 = vadd.f32 %v416_v48, %v415_v34  ;;  %v399_v6 = vsel %vm390_vm14, %v396_v40, 0.0 }
 0x170   : > { %v407_v7 = vadd.f32 %v406_v41, %v399_v6 }
 0x171   : > { %v418_v44 = vrot.slane %v417_v42, 2 }
 0x172   : > { %v408_v45 = vrot.slane %v407_v7, 4 }
 0x173   : > { %v419_v46 = vadd.f32 %v418_v44, %v417_v42 }
 0x174   : > { %v409_v9 = vadd.f32 %v408_v45, %v407_v7 }
 0x175   : > { %v420_v49 = vrot.slane %v419_v46, 1 }
 0x176   : > { %v410_v47 = vrot.slane %v409_v9, 2 }
 0x177   : > { %v421_v10 = vadd.f32 %v420_v49, %v419_v46 }
 0x178   : > { %v411_v50 = vadd.f32 %v410_v47, %v409_v9 }
 0x17a   : > { %v412_v51 = vrot.slane %v411_v50, 1 }
 0x17c   : > { %v413_v52 = vadd.f32 %v412_v51, %v411_v50 }
 0x17e   : > { %v423_v53 = vsel %vm422_vm15, %v413_v52, %v421_v10 }
 0x17f   : > { %424 = vst [vmem:[%s200_s8] sm:$0x3] %v423_v53 }
 0x180   : > { %688 = shalt.err (!%p685_p0)
}
 0x181   : > { %547 = dma.vmem_to_hbm [thread:$0]  (%p792_p9), %s439_s14, 32, %s441_s17, %s426_s13  }
 0x182 PF: > { %p553_p1 = scmp.ge.s32.totalorder %s727_s12, 2  ;;  %s452_s22 = sand.u32 1, %s715_s9  }
 0x183   : > { %s453_s5 = scalar_lea.sflag [#allocation4], %s452_s22 }
 0x184   : > { %p550_p2 = pnand %p553_p1, %p796_p10 }
 0x186   : > { %p551_p3 = pneg %p550_p2 }
 0x188   : > { %710 = dma.done.wait (%p551_p3), %s453_s5, 32  }
 0x189   : > { %712 = vsyncadd (%p551_p3), %s453_s5, 4294967264  ;;  %p15_p4 = scmp.ge.s32.totalorder %s773_s15, 5   ;;  %s1026_s9 = smov %s719_s10 }
 0x18a   : > { %s1027_s10 = smov %s723_s11  ;;  %s1028_s11 = smov %s785_s18 }
 0x18b   : > { %s1029_s12 = smov %s773_s15  ;;  %17 = sbr.rel (!%p15_p4) target bundleno = 5 (0x5), region = 76 }
 0x190   :  { %459 = vsyncpa [#allocation3], 1 }
 0x191   :  { %461 = vsyncpa [#allocation3 + $0x1], 1 }
 0x192   :  { %462 = vsyncpa [#allocation4], 1 }
 0x193   :  { %464 = vsyncpa [#allocation4 + $0x1], 1 }

</bundles_post_ra>
